<compile_context>
chip_gen: v5e
topology: v5e:2x2
jax: 0.10.0
libtpu: 0.0.40
codegen_flags: <defaults>
</compile_context>

<pallas_src>
import functools

import jax
import jax.numpy as jnp
from jax import lax
from jax.experimental import pallas as pl
from jax.experimental.pallas import tpu as pltpu


def _round_up(n: int, m: int) -> int:
    return (n + m - 1) // m * m


def _cdiv(a: int, b: int) -> int:
    return (a + b - 1) // b


def _step_kernel(x_ref, w_ref, b_ref, y_ref, pw_ref,
                 logits_ref, psum_ref, *, batch, out_dim):
    """One (batch-tile, out-tile): logits = x @ W + b ; per-lane BCE partial sums."""
    i = pl.program_id(0)          # batch-tile index
    j = pl.program_id(1)          # out-dim-tile index
    tb, tn = logits_ref.shape

    # ---- forward: logits = x @ W + b  (MXU, f32 accumulate) ----
    logits = jnp.dot(x_ref[...], w_ref[...],
                     preferred_element_type=jnp.float32) + b_ref[...]
    logits_ref[...] = logits.astype(logits_ref.dtype)

    # ---- BCEWithLogits with pos_weight, single-softplus form ----
    # per_elem = (1-y)*z + (1 + (pw-1)*y) * softplus(-z)   (== PyTorch formula)
    y = y_ref[...]
    pw = pw_ref[...]
    sp_neg = jnp.maximum(-logits, 0.0) + jnp.log1p(jnp.exp(-jnp.abs(logits)))
    per_elem = (1.0 - y) * logits + (1.0 + (pw - 1.0) * y) * sp_neg

    # mask ragged batch rows and ragged out-dim columns (Pallas pads OOB reads
    # with unspecified data; jnp.where select semantics keep it out of the sum)
    row = i * tb + lax.broadcasted_iota(jnp.int32, (tb, tn), 0)
    col = j * tn + lax.broadcasted_iota(jnp.int32, (tb, tn), 1)
    valid = jnp.logical_and(row < batch, col < out_dim)
    per_elem = jnp.where(valid, per_elem, 0.0)

    # per-tile per-lane partial sums; the cheap final reduce happens in JAX
    psum_ref[...] = jnp.sum(per_elem, axis=0).reshape(psum_ref.shape)


def nn_module_step(x, w, b, y, pos_weights, *, tb=None, compute_dtype=None):
    """forward (Linear) + BCEWithLogits(pos_weight, mean) in one Pallas kernel.

    x:           [B, Din]    float32
    w:           [Din, Dout] float32 (PyTorch Linear weight, transposed)
    b:           [1, Dout] or [Dout]
    y:           [B, Dout]   targets in {0, 1}
    pos_weights: [1, Dout] or [Dout]
    returns: (logits [B, Dout] f32, loss scalar f32)
    """
    batch, din = x.shape
    din_w, dout = w.shape
    assert din_w == din

    b = jnp.asarray(b, jnp.float32).reshape(1, dout)
    pos_weights = jnp.asarray(pos_weights, jnp.float32).reshape(1, dout)
    y = y.astype(jnp.float32)

    # optional bf16 MXU path for large layers (loss math stays f32)
    if compute_dtype is not None:
        x = x.astype(compute_dtype)
        w = w.astype(compute_dtype)

    # ---- Dout (N) tiling: full-dim block when small, 512-wide tiles when big ----
    tn = dout if dout <= 512 else 512
    nn_tiles = _cdiv(dout, tn)

    # ---- chip-aware VMEM budget (v5e/v6e: 128 MiB physical, v7x: 64 MiB) ----
    try:
        vmem_cap = int(pltpu.get_tpu_info().vmem_capacity_bytes)
    except Exception:
        vmem_cap = 64 << 20          # conservative fallback (v7x)
    tile_budget = max(16 << 20, vmem_cap // 2)

    # VMEM footprint per batch row / fixed, accounting for lane(128)/sublane(8)
    # padding of the physical VMEM blocks (e.g. Din=32 still occupies 128 lanes).
    x_itemsize = jnp.dtype(x.dtype).itemsize
    din_l = _round_up(din, 128)
    din_s = _round_up(din, 8)
    tn_l = _round_up(tn, 128)
    per_row_bytes = x_itemsize * din_l + 4 * 2 * tn_l            # x + (y + logits)
    fixed_bytes = 2 * x_itemsize * din_s * tn_l + 6 * 4 * 8 * tn_l  # W(x2) + b/pw/psum

    tb_max = max(8, (((tile_budget - fixed_bytes) // (2 * per_row_bytes)) // 8) * 8)
    if tb is None:
        tb = min(1024, tb_max, _round_up(batch, 8))
    tb = max(8, min(_round_up(tb, 8), tb_max))
    nb_tiles = _cdiv(batch, tb)

    est = 2 * tb * per_row_bytes + fixed_bytes + (2 << 20)
    vmem_limit = int(min(max(est, 16 << 20), int(vmem_cap * 0.85)))

    kernel = functools.partial(_step_kernel, batch=batch, out_dim=dout)

    logits, psums = pl.pallas_call(
        kernel,
        out_shape=(
            jax.ShapeDtypeStruct((batch, dout), jnp.float32),
            jax.ShapeDtypeStruct((nb_tiles, 1, dout), jnp.float32),
        ),
        grid=(nb_tiles, nn_tiles),
        in_specs=[
            pl.BlockSpec((tb, din), lambda i, j: (i, 0)),    # x tile
            pl.BlockSpec((din, tn), lambda i, j: (0, j)),    # W tile (N-tiled)
            pl.BlockSpec((1, tn), lambda i, j: (0, j)),      # bias
            pl.BlockSpec((tb, tn), lambda i, j: (i, j)),     # targets tile
            pl.BlockSpec((1, tn), lambda i, j: (0, j)),      # pos_weight
        ],
        out_specs=(
            pl.BlockSpec((tb, tn), lambda i, j: (i, j)),       # logits tile
            pl.BlockSpec((1, 1, tn), lambda i, j: (i, 0, j)),  # per-tile partial sums
        ),
        compiler_params=pltpu.CompilerParams(
            # no cross-iteration carry -> both axes parallel (v7x megacore)
            dimension_semantics=("parallel", "parallel"),
            vmem_limit_bytes=vmem_limit,
        ),
    )(x, w, b, y, pos_weights)

    loss = jnp.sum(psums) / float(batch * dout)
    return logits, loss


def _reference_step(x, w, b, y, pw):
    logits = x @ w + b
    softplus = lambda z: jnp.maximum(z, 0.0) + jnp.log1p(jnp.exp(-jnp.abs(z)))
    per_elem = pw * y * softplus(-logits) + (1.0 - y) * softplus(logits)
    return logits, jnp.mean(per_elem)


if __name__ == "__main__":
    # Small shapes consistent with the module: input_dim=32, output_dim=16.
    # B=20 with tb=8 exercises multi-tile partial sums + ragged last batch tile.
    B, INPUT_DIM, OUTPUT_DIM = 20, 32, 16

    key = jax.random.PRNGKey(0)
    kx, kw, kb, ky = jax.random.split(key, 4)

    x = jax.random.normal(kx, (B, INPUT_DIM), dtype=jnp.float32)
    # deterministic "Linear" parameters (weight stored transposed: [Din, Dout])
    w = jax.random.normal(kw, (INPUT_DIM, OUTPUT_DIM), dtype=jnp.float32) * (
        1.0 / jnp.sqrt(float(INPUT_DIM)))
    b = jax.random.normal(kb, (1, OUTPUT_DIM), dtype=jnp.float32) * 0.01
    # multilabel 0/1 targets
    y = (jax.random.uniform(ky, (B, OUTPUT_DIM)) > 0.5).astype(jnp.float32)
    # nontrivial but deterministic pos_weights (module defaults to all-ones)
    pos_weights = jnp.linspace(0.5, 2.0, OUTPUT_DIM, dtype=jnp.float32).reshape(1, OUTPUT_DIM)

    logits, loss = nn_module_step(x, w, b, y, pos_weights, tb=8)
    jax.block_until_ready((logits, loss))

    ref_logits, ref_loss = _reference_step(x, w, b, y, pos_weights)
    assert logits.shape == (B, OUTPUT_DIM)
    assert jnp.allclose(logits, ref_logits, atol=1e-4, rtol=1e-4)
    assert jnp.allclose(loss, ref_loss, atol=1e-5, rtol=1e-5)

    print("KERNEL_OK")
</pallas_src>

<mosaic_0001>
module attributes {stable_mosaic.version = 11 : i64} {
  func.func @_step_kernel(%arg0: i32, %arg1: i32, %arg2: memref<8x32xf32, #tpu.memory_space<vmem>>, %arg3: memref<32x16xf32, #tpu.memory_space<vmem>>, %arg4: memref<1x16xf32, #tpu.memory_space<vmem>>, %arg5: memref<8x16xf32, #tpu.memory_space<vmem>>, %arg6: memref<1x16xf32, #tpu.memory_space<vmem>>, %arg7: memref<8x16xf32, #tpu.memory_space<vmem>>, %arg8: memref<1x1x16xf32, #tpu.memory_space<vmem>>) attributes {dimension_semantics = [#tpu.dimension_semantics<parallel>, #tpu.dimension_semantics<parallel>], iteration_bounds = array<i64: 3, 1>, scalar_prefetch = 0 : i64, scratch_operands = 0 : i64, tpu.core_type = #tpu.core_type<tc>, window_params = [{transform_indices = @transform_0, window_bounds = array<i64: 8, 32>}, {transform_indices = @transform_1, window_bounds = array<i64: 32, 16>}, {transform_indices = @transform_2, window_bounds = array<i64: 1, 16>}, {transform_indices = @transform_3, window_bounds = array<i64: 8, 16>}, {transform_indices = @transform_4, window_bounds = array<i64: 1, 16>}, {transform_indices = @transform_5, window_bounds = array<i64: 8, 16>}, {transform_indices = @transform_6, window_bounds = array<i64: 1, 1, 16>}]} {
    %c0 = arith.constant 0 : index
    %c0_0 = arith.constant 0 : index
    %0 = vector.load %arg2[%c0, %c0_0] : memref<8x32xf32, #tpu.memory_space<vmem>>, vector<8x32xf32>
    %c0_1 = arith.constant 0 : index
    %c0_2 = arith.constant 0 : index
    %1 = vector.load %arg3[%c0_1, %c0_2] : memref<32x16xf32, #tpu.memory_space<vmem>>, vector<32x16xf32>
    %cst = arith.constant dense<0.000000e+00> : vector<8x16xf32>
    %2 = tpu.matmul %0, %1, %cst {dimension_numbers = #tpu.dot_dimension_numbers<[1], [0], [0], [1], [0, 0, 1, 1], [], []>} : vector<8x32xf32>, vector<32x16xf32>, vector<8x16xf32> -> vector<8x16xf32>
    %c0_3 = arith.constant 0 : index
    %c0_4 = arith.constant 0 : index
    %3 = vector.load %arg4[%c0_3, %c0_4] : memref<1x16xf32, #tpu.memory_space<vmem>>, vector<1x16xf32>
    %4 = vector.broadcast %3 : vector<1x16xf32> to vector<8x16xf32>
    %5 = arith.addf %2, %4 : vector<8x16xf32>
    %c0_5 = arith.constant 0 : index
    %c0_6 = arith.constant 0 : index
    %6 = vector.load %arg7[%c0_5, %c0_6] : memref<8x16xf32, #tpu.memory_space<vmem>>, vector<8x16xf32>
    tpu.vector_store %arg7[%c0_5, %c0_6], %5 {strides = array<i32>} : memref<8x16xf32, #tpu.memory_space<vmem>>, vector<8x16xf32>,
    %c0_7 = arith.constant 0 : index
    %c0_8 = arith.constant 0 : index
    %7 = vector.load %arg5[%c0_7, %c0_8] : memref<8x16xf32, #tpu.memory_space<vmem>>, vector<8x16xf32>
    %c0_9 = arith.constant 0 : index
    %c0_10 = arith.constant 0 : index
    %8 = vector.load %arg6[%c0_9, %c0_10] : memref<1x16xf32, #tpu.memory_space<vmem>>, vector<1x16xf32>
    %cst_11 = arith.constant 0.000000e+00 : f32
    %9 = vector.broadcast %cst_11 : f32 to vector<8x16xf32>
    %10 = arith.subf %9, %5 : vector<8x16xf32>
    %cst_12 = arith.constant 0.000000e+00 : f32
    %11 = vector.broadcast %cst_12 : f32 to vector<8x16xf32>
    %12 = arith.maximumf %10, %11 : vector<8x16xf32>
    %13 = math.absf %5 : vector<8x16xf32>
    %cst_13 = arith.constant 0.000000e+00 : f32
    %14 = vector.broadcast %cst_13 : f32 to vector<8x16xf32>
    %15 = arith.subf %14, %13 : vector<8x16xf32>
    %16 = math.exp %15 : vector<8x16xf32>
    %17 = math.log1p %16 : vector<8x16xf32>
    %18 = arith.addf %12, %17 : vector<8x16xf32>
    %cst_14 = arith.constant 1.000000e+00 : f32
    %19 = vector.broadcast %cst_14 : f32 to vector<8x16xf32>
    %20 = arith.subf %19, %7 : vector<8x16xf32>
    %21 = arith.mulf %20, %5 : vector<8x16xf32>
    %cst_15 = arith.constant 1.000000e+00 : f32
    %22 = vector.broadcast %cst_15 : f32 to vector<1x16xf32>
    %23 = arith.subf %8, %22 : vector<1x16xf32>
    %24 = vector.broadcast %23 : vector<1x16xf32> to vector<8x16xf32>
    %25 = arith.mulf %24, %7 : vector<8x16xf32>
    %cst_16 = arith.constant 1.000000e+00 : f32
    %26 = vector.broadcast %cst_16 : f32 to vector<8x16xf32>
    %27 = arith.addf %26, %25 : vector<8x16xf32>
    %28 = arith.mulf %27, %18 : vector<8x16xf32>
    %29 = arith.addf %21, %28 : vector<8x16xf32>
    %c8_i32 = arith.constant 8 : i32
    %30 = arith.muli %arg0, %c8_i32 : i32
    %31 = tpu.iota {dimensions = array<i32: 0>} : vector<8x16xi32>
    %32 = vector.broadcast %30 : i32 to vector<8x16xi32>
    %33 = arith.addi %32, %31 : vector<8x16xi32>
    %c16_i32 = arith.constant 16 : i32
    %34 = arith.muli %arg1, %c16_i32 : i32
    %35 = tpu.iota {dimensions = array<i32: 1>} : vector<8x16xi32>
    %36 = vector.broadcast %34 : i32 to vector<8x16xi32>
    %37 = arith.addi %36, %35 : vector<8x16xi32>
    %c20_i32 = arith.constant 20 : i32
    %38 = vector.broadcast %c20_i32 : i32 to vector<8x16xi32>
    %39 = arith.cmpi slt, %33, %38 : vector<8x16xi32>
    %c16_i32_17 = arith.constant 16 : i32
    %40 = vector.broadcast %c16_i32_17 : i32 to vector<8x16xi32>
    %41 = arith.cmpi slt, %37, %40 : vector<8x16xi32>
    %42 = arith.andi %39, %41 : vector<8x16xi1>
    %cst_18 = arith.constant 0.000000e+00 : f32
    %43 = vector.broadcast %cst_18 : f32 to vector<8x16xf32>
    %44 = arith.select %42, %29, %43 : vector<8x16xi1>, vector<8x16xf32>
    %cst_19 = arith.constant dense<0.000000e+00> : vector<16xf32>
    %45 = vector.multi_reduction <add>, %44, %cst_19 [0] : vector<8x16xf32> to vector<16xf32>
    %46 = vector.shape_cast %45 : vector<16xf32> to vector<1x1x16xf32>
    %c0_20 = arith.constant 0 : index
    %c0_21 = arith.constant 0 : index
    %c0_22 = arith.constant 0 : index
    %47 = vector.load %arg8[%c0_20, %c0_21, %c0_22] : memref<1x1x16xf32, #tpu.memory_space<vmem>>, vector<1x1x16xf32>
    tpu.vector_store %arg8[%c0_20, %c0_21, %c0_22], %46 {strides = array<i32>} : memref<1x1x16xf32, #tpu.memory_space<vmem>>, vector<1x1x16xf32>,
    return
  }
  func.func @transform_0(%arg0: i32, %arg1: i32) -> (i32, i32) {
    %c0_i32 = arith.constant 0 : i32
    %c0_i32_0 = arith.constant 0 : i32
    return %arg0, %c0_i32 : i32, i32
  }
  func.func @transform_1(%arg0: i32, %arg1: i32) -> (i32, i32) {
    %c0_i32 = arith.constant 0 : i32
    %c0_i32_0 = arith.constant 0 : i32
    return %c0_i32, %arg1 : i32, i32
  }
  func.func @transform_2(%arg0: i32, %arg1: i32) -> (i32, i32) {
    %c0_i32 = arith.constant 0 : i32
    %c0_i32_0 = arith.constant 0 : i32
    return %c0_i32, %arg1 : i32, i32
  }
  func.func @transform_3(%arg0: i32, %arg1: i32) -> (i32, i32) {
    %c0_i32 = arith.constant 0 : i32
    return %arg0, %arg1 : i32, i32
  }
  func.func @transform_4(%arg0: i32, %arg1: i32) -> (i32, i32) {
    %c0_i32 = arith.constant 0 : i32
    %c0_i32_0 = arith.constant 0 : i32
    return %c0_i32, %arg1 : i32, i32
  }
  func.func @transform_5(%arg0: i32, %arg1: i32) -> (i32, i32) {
    %c0_i32 = arith.constant 0 : i32
    return %arg0, %arg1 : i32, i32
  }
  func.func @transform_6(%arg0: i32, %arg1: i32) -> (i32, i32, i32) {
    %c0_i32 = arith.constant 0 : i32
    %c0_i32_0 = arith.constant 0 : i32
    return %arg0, %c0_i32, %arg1 : i32, i32, i32
  }
}

</mosaic_0001>

<bundles_post_ra>
// kernel: tpu_custom_call.1
= control target key start
LH: loop header
LB: loop body
LE: loop exit
PB: predicated region body
PF: predicated region fallthrough
CT: control target
= control target key end

     0   :  { %12 = vsyncpa [#allocation3], 0  ;;  %s926_s0 = inlined_call_operand.vmem [shape: f32[20,32], index: 0, kind: input, shape index: {}]   ;;  %s927_s1 = inlined_call_operand.vmem [shape: f32[32,16], index: 1, kind: input, shape index: {}]   ;;  %s928_s2 = inlined_call_operand.vmem [shape: f32[1,16], index: 2, kind: input, shape index: {}]   ;;  %s929_s3 = inlined_call_operand.vmem [shape: f32[20,16], index: 3, kind: input, shape index: {}]   ;;  %s930_s4 = inlined_call_operand.vmem [shape: f32[1,16], index: 4, kind: input, shape index: {}]   ;;  %s931_s5 = inlined_call_operand.vmem [shape: f32[20,16], index: 5, kind: output, shape index: {0}]   ;;  %s932_s6 = inlined_call_operand.hbm [shape: f32[3,1,16], index: 6, kind: output, shape index: {1}]  }
   0x1   :  { %14 = vsyncpa [#allocation3 + $0x1], 0  ;;  %s802_s21 = smov 0   ;;  %s804_s22 = smov 0  }
   0x2   :  { %s806_s23 = smov 0   ;;  %s808_s24 = smov 0  }
   0x3   :  { %s810_s25 = smov 0   ;;  %s812_s26 = smov 0  }
   0x4 LB: > { %s611_s27 = sadd.s32 4294967295, %s765_s26   ;;  %s612_s28 = sadd.s32 4294967294, %s765_s26   ;;  %s765_s26 = sphi %s812_s26, %s20_s26   ;;  %s761_s25 = sphi %s810_s25, %s939_s25   ;;  %s757_s24 = sphi %s808_s24, %s938_s24   ;;  %s753_s23 = sphi %s806_s23, %s937_s23   ;;  %s749_s22 = sphi %s804_s22, %s936_s22   ;;  %s745_s21 = sphi %s802_s21, %s935_s21  }
   0x5   : > { %s32_s29 = sadd.s32 1, %s761_s25  ;;  %s201_s30 = sadd.s32 1, %s753_s23 }
   0x6   : > { %p34_p0 = scmp.ge.s32.totalorder %s32_s29, 3  ;;  %p211_p1 = scmp.ne.s32.totalorder %s753_s23, %s749_s22 }
   0x7   : > { %p212_p2 = scmp.eq.s32.totalorder %s611_s27, 2  ;;  %p217_p3 = scmp.ne.s32.totalorder %s749_s22, %s745_s21 }
   0x8   : > { %s941_s29 = smov (%p34_p0, %s32_s29), 0  ;;  %p218_p5 = scmp.eq.s32.totalorder %s612_s28, 2 }
   0x9   : > { %p842_p4 = por %p212_p2, %p211_p1  ;;  %s196_s8 = ssub.s32 %s761_s25, %s941_s29 }
   0xa   : > { %p618_p6 = scmp.ge.s32.totalorder %s765_s26, 1  ;;  %p199_p7 = scmp.eq.s32.totalorder %s196_s8, 0 }
   0xb   : > { %p849_p8 = por %p218_p5, %p217_p3  ;;  %p272_p9 = scmp.lt.s32.totalorder %s765_s26, 4 }
   0xc   : > { %s855_s10 = scalar_select %p199_p7, %s753_s23, %s201_s30  }
   0xd   : > { %p273_p10 = pnand %p618_p6, %p272_p9 }
   0xe   : > { %p324_p11 = scmp.lt.s32.totalorder (!%p273_p10), %s757_s24, 2  ;;  %s624_s27 = sshll.u32 (!%p273_p10), %s757_s24, 3 }
   0xf   : > { %276 = sbr.rel (%p273_p10) target bundleno = 204 (0xcc), region = 40  ;;  %s458_s8 = scalar_lea.hbm (!%p273_p10), %s932_s6, %s757_s24 }
  0x10   : > { %s462_s13 = sshll.u32 (!%p273_p10), %s458_s8, 4  ;;  %s707_s18 = scalar_lea.hbm (!%p273_p10), %s932_s6, 3  ;;  %s463_s13 = int_to_ptr.hbm [resolvable:$true] %s462_s13 }
  0x11   : > { %s701_s15 = sshra.s32 (!%p273_p10), %s463_s13, 4  ;;  %s702_s15 = int_to_ptr.hbm [resolvable:$true] %s701_s15 }
  0x12   : > { %s703_s16 = scalar_lea.hbm (!%p273_p10), %s702_s15, 1  ;;  %p708_p1 = scmp.lt.s32.totalorder (!%p273_p10), %s702_s15, %s932_s6 }
  0x13   : > { %p704_p12 = scmp.ne.s32.totalorder (!%p273_p10), %s702_s15, %s703_s16  ;;  %p709_p2 = scmp.lt.s32.totalorder (!%p273_p10), %s707_s18, %s703_s16 }
  0x14   : > { %v356_v0 = vld [vmem:[%s927_s1 + $0x18] sm:$0xff]  ;;  %v355_v1 = vld [vmem:[%s927_s1 + $0x10] sm:$0xff]  ;;  %v354_v2 = vld [vmem:[%s927_s1 + $0x8] sm:$0xff]  ;;  %s325_s17 = scalar_select %p324_p11, %s757_s24, 2  ;;  %vm361_vm0 = vcmask 261120   ;;  %vm385_vm1 = vcmask 130048   ;;  %v416_v15 = vlaneseq  ;;  %v418_v21 = vstv %s624_s27 }
  0x15   : > { %377 = vmatpush.msra.mxu0 %v356_v0  ;;  %v353_v3 = vld [vmem:[%s927_s1] sm:$0xff]  ;;  %vm436_vm6 = vcmask 122880   ;;  %p705_p13 = pnand %p704_p12, %p842_p4  ;;  %p710_p3 = por %p709_p2, %p708_p1 }
  0x16   : > { %s619_s20 = sshll.u32 %s325_s17, 3  ;;  %v682_v5 = vld [vmem:[%s928_s2] ss:$0 sm:$0xff]  ;;  %v417_v18 = vshrl.u32 %v416_v15, 7  ;;  %v422_v27 = vand.u32 127, %v416_v15 }
  0x17   : > { %378 = vmatpush.msra.mxu0 %v355_v1  ;;  %s327_s30 = scalar_lea.vmem %s926_s0, %s619_s20  ;;  %s351_s14 = scalar_lea.vmem %s931_s5, %s619_s20  ;;  %v388_v11 = vld [vmem:[%s930_s4] sm:$0x1] }
  0x18   : > { %v352_v4 = vld [vmem:[%s327_s30] sm:$0xff]  ;;  %v623_v12 = vadd.f32 -1.0, %v388_v11  ;;  %s341_s19 = scalar_lea.vmem %s929_s3, %s619_s20  ;;  %v419_v26 = vadd.s32 %v418_v21, %v417_v18  ;;  %vm426_vm4 = vcmp.lt.s32.totalorder %v422_v27, 16  ;;  %s322_s20 = sand.u32 1, %s749_s22  }
  0x19   : > { %379 = vmatpush.msra.mxu0 %v354_v2  ;;  %v387_v19 = vld [vmem:[%s341_s19] sm:$0xff]  ;;  %s323_s11 = scalar_lea.vmem [#allocation2], %s322_s20  ;;  %p706_p0 = pneg %p705_p13 }
  0x1a   : > { %v409_v17 = vperm.slane %v623_v12, 0  ;;  %v405_v30 = vsub.f32 1.0, %v387_v19  ;;  %vm425_vm3 = vcmp.lt.s32.totalorder %v419_v26, 20  ;;  %s460_s12 = sshll.u32 %s323_s11, 4  ;;  %s461_s12 = int_to_ptr.vmem [resolvable:$true] %s460_s12 }
  0x1b   : > { %380 = vmatpush.msra.mxu0 %v353_v3  ;;  %vm427_vm5 = vmand %vm425_vm3, %vm426_vm4  ;;  %p711_p5 = pnand %p710_p3, %p706_p0 }
  0x1c   : > { %622 = vmatmul.msk.f32.vlgmr.msra.gmra.mxu0 %vm361_vm0, %v352_v4  ;;  %v411_v22 = vmul.f32 %v409_v17, %v387_v19 }
  0x1e   : > { %v412_v31 = vadd.f32 1.0, %v411_v22 }
  0x99   : > { %v382_v6 = vpop.f32.mrf.mxu0 }
  0x9a   : > { %v383_v7 = vadd.f32 %v682_v5, %v382_v6 }
  0x9c   : > { %386 = vst.msk [vmem:[%s351_s14] sm:$0xff] %vm385_vm1, %v383_v7  ;;  %v391_v8 = vand.u32 2147483647, %v383_v7  ;;  %v389_v23 = vsub.f32 0.0, %v383_v7  ;;  %v406_v35 = vmul.f32 %v405_v30, %v383_v7  ;;  %s446_s14 = scalar_lea.sflag [#allocation3], %s322_s20 }
  0x9e   : > { %v392_v9 = vsub.f32 0.0, %v391_v8  ;;  %v390_v32 = vmax.f32 %v389_v23, 0.0 }
  0xa0   : > { %v393_v10 = vmul.f32 1.442695, %v392_v9 }
  0xa2   : > { %683 = vpow2.f32 %v393_v10 }
  0xa8   : > { %v684_v13 = vpop.eup %683 }
  0xa9   : > { %v395_v14 = vadd.f32 1.0, %v684_v13  ;;  %v398_v16 = vmul.f32 -0.5, %v684_v13  ;;  %v401_v24 = vand.u32 2147483647, %v684_v13 }
  0xab   : > { %685 = vlog2.f32 %v395_v14  ;;  %v399_v20 = vadd.f32 1.0, %v398_v16  ;;  %vm402_vm2 = vcmp.lt.f32.partialorder %v401_v24, 0.0004427343 }
  0xad   : > { %v400_v29 = vmul.f32 %v684_v13, %v399_v20 }
  0xb1   : > { %v686_v25 = vpop.eup %685 }
  0xb2   : > { %v397_v28 = vmul.f32 0.6931472, %v686_v25 }
  0xb4   : > { %v403_v33 = vsel %vm402_vm2, %v400_v29, %v397_v28 }
  0xb5   : > { %v404_v34 = vadd.f32 %v403_v33, %v390_v32 }
  0xb7   : > { %v413_v36 = vmul.f32 %v412_v31, %v404_v34 }
  0xb9   : > { %v414_v37 = vadd.f32 %v413_v36, %v406_v35 }
  0xbb   : > { %v428_v38 = vsel %vm427_vm5, %v414_v37, 0.0 }
  0xbc   : > { %v429_v39 = vsel %vm385_vm1, %v428_v38, 0.0 }
  0xbd   : > { %v430_v40 = vrot.slane %v429_v39, 4 }
  0xbf   : > { %v431_v41 = vadd.f32 %v430_v40, %v429_v39 }
  0xc1   : > { %v432_v42 = vrot.slane %v431_v41, 2 }
  0xc3   : > { %v433_v43 = vadd.f32 %v432_v42, %v431_v41 }
  0xc5   : > { %v434_v44 = vrot.slane %v433_v43, 1 }
  0xc7   : > { %v435_v45 = vadd.f32 %v434_v44, %v433_v43 }
  0xc9   : > { %437 = vst.msk [vmem:[%s323_s11] sm:$0x1] %vm436_vm6, %v435_v45 }
  0xca   : > { %714 = shalt.err (!%p711_p5)
}
  0xcb   : > { %627 = dma.vmem_to_hbm [thread:$0]  (%p842_p4), %s461_s12, 16, %s463_s13, %s446_s14  }
  0xcc PF: > { %p633_p6 = scmp.ge.s32.totalorder %s765_s26, 2  ;;  %s484_s20 = sand.u32 1, %s745_s21  }
  0xcd   : > { %s485_s28 = scalar_lea.sflag [#allocation3], %s484_s20 }
  0xce   : > { %p630_p7 = pnand %p633_p6, %p849_p8 }
  0xd0   : > { %p631_p9 = pneg %p630_p7 }
  0xd2   : > { %740 = dma.done.wait (%p631_p9), %s485_s28, 16  }
  0xd3   : > { %742 = vsyncadd (%p631_p9), %s485_s28, 4294967280  ;;  %s20_s26 = sadd.s32 1, %s765_s26   ;;  %s935_s21 = smov %s749_s22 }
  0xd4   : > { %p17_p10 = scmp.ge.s32.totalorder %s20_s26, 5   ;;  %s936_s22 = smov %s753_s23 }
  0xd5   : > { %s937_s23 = smov %s855_s10  ;;  %s938_s24 = smov %s761_s25 }
  0xd6   : > { %s939_s25 = smov %s941_s29  ;;  %19 = sbr.rel (!%p17_p10) target bundleno = 4 (0x4), region = 99 }
  0xdb   :  { %490 = vsyncpa [#allocation3], 1 }
  0xdc   :  { %492 = vsyncpa [#allocation3 + $0x1], 1 }

</bundles_post_ra>
